<compile_context>
chip_gen: v7x
topology: tpu7x:2x2x1
jax: 0.10.0
libtpu: 0.0.40
codegen_flags: <defaults>
</compile_context>

<pallas_src>
import functools

import jax
import jax.numpy as jnp
from jax.experimental import pallas as pl
from jax.experimental.pallas import tpu as pltpu


def _round_up(a, m):
    return (a + m - 1) // m * m


def _ffn_kernel(x_ref, wup_ref, bup_ref, w2_ref, b2_ref, o_ref, acc_ref, *, tn):
    """Grid = (row tile i [parallel], 2H-reduction tile j [arbitrary]).

    x_ref   : [tm, Hp]      bf16 activation tile (same for all j)
    wup_ref : [Hp, 2*tn]    fused [ffn1 slab | gate slab] weights for slab j
    bup_ref : [1, 2*tn]     fused biases (f32) for slab j
    w2_ref  : [tn, Hp]      down-projection rows for slab j
    b2_ref  : [1, Hp]       down-projection bias (f32)
    o_ref   : [tm, Hp]      output tile (written once, at j == last)
    acc_ref : [tm, Hp] f32  VMEM accumulator scratch
    """
    j = pl.program_id(1)

    @pl.when(j == 0)
    def _init():
        acc_ref[...] = jnp.zeros_like(acc_ref)

    x = x_ref[...]  # bf16 [tm, Hp]

    # Fused up-projection: one wide MXU matmul, f32 accumulation.
    up = jnp.dot(x, wup_ref[...], preferred_element_type=jnp.float32)
    up = up + bup_ref[...]                       # f32 bias add, once per slab

    # Split fused result; elementwise gating stays in f32 (VPU-friendly on v5e too).
    x1 = up[:, :tn]
    x2 = jnp.maximum(up[:, tn:], 0.0)            # ReLU gate
    xx = (x1 * x2).astype(w2_ref.dtype)          # bf16 for the second MXU pass

    # Accumulate the down-projection contribution of this slab.
    acc_ref[...] += jnp.dot(xx, w2_ref[...], preferred_element_type=jnp.float32)

    @pl.when(j == pl.num_programs(1) - 1)
    def _finalize():
        o_ref[...] = (acc_ref[...] + b2_ref[...]).astype(o_ref.dtype)


def feedforward_pallas(x, params, *, tm_cap=256, tn_cap=512,
                       compute_dtype=jnp.bfloat16):
    """x: [..., H] float32. params: dict of pre-transposed f32 weights/biases.

    tm_cap: row-tile cap (multiple of 16).  tn_cap: 2H-reduction slab cap
    (multiple of 128).  On v7x (64 MiB VMEM) with very large H, use tn_cap=256.
    """
    w1, b1 = params["w1"], params["b1"]   # [H, 2H], [1, 2H]
    wg, bg = params["wg"], params["bg"]   # [H, 2H], [1, 2H]
    w2, b2 = params["w2"], params["b2"]   # [2H, H], [1, H]

    orig_shape = x.shape
    H = orig_shape[-1]
    N = 2 * H
    x2d = x.reshape(-1, H)
    M = x2d.shape[0]

    # ---- padded / tiled geometry -------------------------------------------
    Hp = _round_up(H, 128)            # lane-dense output + MXU-friendly contraction
    Np = 2 * Hp                       # padded intermediate (2H) dim
    tm = min(tm_cap, _round_up(M, 16))
    Mp = _round_up(M, tm)
    tn = 128
    for cand in (512, 256, 128):      # largest 128-multiple that divides Np and <= cap
        if cand <= max(tn_cap, 128) and Np % cand == 0:
            tn = cand
            break
    n_i = Mp // tm
    n_j = Np // tn

    # ---- pad + pack operands (zero padding keeps the math exact) -----------
    xp = jnp.pad(x2d, ((0, Mp - M), (0, Hp - H))).astype(compute_dtype)

    w1p = jnp.pad(w1, ((0, Hp - H), (0, Np - N)))
    wgp = jnp.pad(wg, ((0, Hp - H), (0, Np - N)))
    b1p = jnp.pad(b1, ((0, 0), (0, Np - N)))
    bgp = jnp.pad(bg, ((0, 0), (0, Np - N)))

    # Fuse ffn1 + gate: per j-slab of width tn, lay the ffn1 slab next to the gate
    # slab so the kernel does a single [Hp, 2*tn] matmul and splits the result.
    w_up = jnp.concatenate(
        [w1p.reshape(Hp, n_j, tn), wgp.reshape(Hp, n_j, tn)], axis=2
    ).reshape(Hp, 2 * Np).astype(compute_dtype)
    b_up = jnp.concatenate(
        [b1p.reshape(1, n_j, tn), bgp.reshape(1, n_j, tn)], axis=2
    ).reshape(1, 2 * Np).astype(jnp.float32)

    w2p = jnp.pad(w2, ((0, Np - N), (0, Hp - H))).astype(compute_dtype)
    b2p = jnp.pad(b2, ((0, 0), (0, Hp - H))).astype(jnp.float32)

    kernel = functools.partial(_ffn_kernel, tn=tn)

    flops = 6 * Mp * Hp * Np            # 2*M*Hp*(2*Np) up + 2*M*Np*Hp down
    bytes_accessed = int(
        xp.size * xp.dtype.itemsize
        + w_up.size * w_up.dtype.itemsize
        + b_up.size * b_up.dtype.itemsize
        + w2p.size * w2p.dtype.itemsize
        + b2p.size * b2p.dtype.itemsize
        + Mp * Hp * jnp.dtype(x.dtype).itemsize
    )

    out_p = pl.pallas_call(
        kernel,
        out_shape=jax.ShapeDtypeStruct((Mp, Hp), x.dtype),
        grid_spec=pltpu.PrefetchScalarGridSpec(
            num_scalar_prefetch=0,
            grid=(n_i, n_j),
            in_specs=[
                pl.BlockSpec((tm, Hp), lambda i, j: (i, 0)),        # x tile
                pl.BlockSpec((Hp, 2 * tn), lambda i, j: (0, j)),    # fused up weights
                pl.BlockSpec((1, 2 * tn), lambda i, j: (0, j)),     # fused up biases
                pl.BlockSpec((tn, Hp), lambda i, j: (j, 0)),        # down weights
                pl.BlockSpec((1, Hp), lambda i, j: (0, 0)),         # down bias
            ],
            out_specs=pl.BlockSpec((tm, Hp), lambda i, j: (i, 0)),  # resident over j
            scratch_shapes=[pltpu.VMEM((tm, Hp), jnp.float32)],     # f32 accumulator
        ),
        compiler_params=pltpu.CompilerParams(
            dimension_semantics=("parallel", "arbitrary"),
            vmem_limit_bytes=48 * 1024 * 1024,   # headroom under v7x's 64 MiB
        ),
        cost_estimate=pl.CostEstimate(
            flops=flops, transcendentals=0, bytes_accessed=bytes_accessed),
        # TODO(synk): if profiling shows exposed weight DMA at small M / large H,
        # add pipeline_mode=pl.Buffered(3) on the weight BlockSpecs.
    )(xp, w_up, b_up, w2p, b2p)

    return out_p[:M, :H].reshape(orig_shape)


def init_params(key, hidden_size):
    """Deterministic init mimicking torch.nn.Linear (uniform +-1/sqrt(fan_in)).

    Weights are stored transposed: [in_features, out_features]."""
    H = hidden_size
    ks = jax.random.split(key, 6)

    def uinit(k, shape, fan_in):
        bound = 1.0 / jnp.sqrt(fan_in)
        return jax.random.uniform(k, shape, jnp.float32, -bound, bound)

    return {
        "w1": uinit(ks[0], (H, 2 * H), H),
        "b1": uinit(ks[1], (1, 2 * H), H),
        "wg": uinit(ks[2], (H, 2 * H), H),
        "bg": uinit(ks[3], (1, 2 * H), H),
        "w2": uinit(ks[4], (2 * H, H), 2 * H),
        "b2": uinit(ks[5], (1, H), 2 * H),
    }


def feedforward_ref_f32(x2d, params):
    """Pure-f32 JAX reference matching the PyTorch forward."""
    x1 = x2d @ params["w1"] + params["b1"][0]
    x2 = jnp.maximum(x2d @ params["wg"] + params["bg"][0], 0.0)
    return (x1 * x2) @ params["w2"] + params["b2"][0]


def feedforward_ref_bf16(x2d, params):
    """Reference matching the kernel's mixed precision (bf16 MXU, f32 accumulate)."""
    bf = jnp.bfloat16
    xb = x2d.astype(bf)
    x1 = jnp.dot(xb, params["w1"].astype(bf),
                 preferred_element_type=jnp.float32) + params["b1"][0]
    g = jnp.dot(xb, params["wg"].astype(bf),
                preferred_element_type=jnp.float32) + params["bg"][0]
    x2 = jnp.maximum(g, 0.0)
    xx = (x1 * x2).astype(bf)
    return jnp.dot(xx, params["w2"].astype(bf),
                   preferred_element_type=jnp.float32) + params["b2"][0]


if __name__ == "__main__":
    key = jax.random.PRNGKey(0)
    kp, kx, kp2, kx2 = jax.random.split(key, 4)

    # Primary demo at the shapes implied by the module.
    batch, seq, hidden = 2, 8, 32
    params = init_params(kp, hidden)
    x = jax.random.normal(kx, (batch, seq, hidden), jnp.float32)

    out = feedforward_pallas(x, params)
    out = jax.block_until_ready(out)
    assert out.shape == x.shape

    x2d = x.reshape(-1, hidden)
    ref_bf16 = feedforward_ref_bf16(x2d, params).reshape(x.shape)
    ref_f32 = feedforward_ref_f32(x2d, params).reshape(x.shape)
    assert jnp.allclose(out, ref_bf16, atol=5e-3, rtol=5e-3), "mismatch vs bf16 ref"
    assert jnp.allclose(out, ref_f32, atol=5e-2, rtol=5e-2), "mismatch vs f32 ref"

    # Second check: exercises row tiling (3 i-tiles), 2H-reduction accumulation
    # (2 j-slabs) and H padding (96 -> 128), still tiny.
    b2_, s2_, h2_ = 2, 24, 96
    params2 = init_params(kp2, h2_)
    x2_in = jax.random.normal(kx2, (b2_, s2_, h2_), jnp.float32)
    out2 = feedforward_pallas(x2_in, params2, tm_cap=16, tn_cap=128)
    out2 = jax.block_until_ready(out2)
    ref2 = feedforward_ref_bf16(x2_in.reshape(-1, h2_), params2).reshape(x2_in.shape)
    assert jnp.allclose(out2, ref2, atol=5e-3, rtol=5e-3), "tiled-path mismatch"

    print("KERNEL_OK")
</pallas_src>

<mosaic_0001>
module attributes {stable_mosaic.version = 11 : i64} {
  func.func @_ffn_kernel(%arg0: i32, %arg1: i32, %arg2: memref<16x128xbf16, #tpu.memory_space<vmem>>, %arg3: memref<128x512xbf16, #tpu.memory_space<vmem>>, %arg4: memref<1x512xf32, #tpu.memory_space<vmem>>, %arg5: memref<256x128xbf16, #tpu.memory_space<vmem>>, %arg6: memref<1x128xf32, #tpu.memory_space<vmem>>, %arg7: memref<16x128xf32, #tpu.memory_space<vmem>>, %arg8: memref<16x128xf32, #tpu.memory_space<vmem>>) attributes {dimension_semantics = [#tpu.dimension_semantics<parallel>, #tpu.dimension_semantics<arbitrary>], iteration_bounds = array<i64: 1, 1>, scalar_prefetch = 0 : i64, scratch_operands = 1 : i64, tpu.core_type = #tpu.core_type<tc>, window_params = [{transform_indices = @transform_0, window_bounds = array<i64: 16, 128>}, {transform_indices = @transform_1, window_bounds = array<i64: 128, 512>}, {transform_indices = @transform_2, window_bounds = array<i64: 1, 512>}, {transform_indices = @transform_3, window_bounds = array<i64: 256, 128>}, {pipeline_mode = #tpu.pipeline_mode<synchronous>, transform_indices = @transform_4, window_bounds = array<i64: 1, 128>}, {transform_indices = @transform_5, window_bounds = array<i64: 16, 128>}]} {
    %c0_i32 = arith.constant 0 : i32
    %0 = arith.cmpi eq, %arg1, %c0_i32 : i32
    %1 = arith.extui %0 : i1 to i32
    %c0_i32_0 = arith.constant 0 : i32
    %2 = arith.cmpi ne, %1, %c0_i32_0 : i32
    scf.if %2 {
      %cst_16 = arith.constant 0.000000e+00 : f32
      %23 = vector.broadcast %cst_16 : f32 to vector<16x128xf32>
      %c0_17 = arith.constant 0 : index
      %c0_18 = arith.constant 0 : index
      %24 = vector.load %arg8[%c0_17, %c0_18] : memref<16x128xf32, #tpu.memory_space<vmem>>, vector<16x128xf32>
      tpu.vector_store %arg8[%c0_17, %c0_18], %23 {strides = array<i32>} : memref<16x128xf32, #tpu.memory_space<vmem>>, vector<16x128xf32>,
    } else {
    }
    %c0 = arith.constant 0 : index
    %c0_1 = arith.constant 0 : index
    %3 = vector.load %arg2[%c0, %c0_1] : memref<16x128xbf16, #tpu.memory_space<vmem>>, vector<16x128xbf16>
    %c0_2 = arith.constant 0 : index
    %c0_3 = arith.constant 0 : index
    %4 = vector.load %arg3[%c0_2, %c0_3] : memref<128x512xbf16, #tpu.memory_space<vmem>>, vector<128x512xbf16>
    %cst = arith.constant dense<0.000000e+00> : vector<16x512xf32>
    %5 = tpu.matmul %3, %4, %cst {dimension_numbers = #tpu.dot_dimension_numbers<[1], [0], [0], [1], [0, 0, 1, 1], [], []>} : vector<16x128xbf16>, vector<128x512xbf16>, vector<16x512xf32> -> vector<16x512xf32>
    %c0_4 = arith.constant 0 : index
    %c0_5 = arith.constant 0 : index
    %6 = vector.load %arg4[%c0_4, %c0_5] : memref<1x512xf32, #tpu.memory_space<vmem>>, vector<1x512xf32>
    %7 = vector.broadcast %6 : vector<1x512xf32> to vector<16x512xf32>
    %8 = arith.addf %5, %7 : vector<16x512xf32>
    %9 = vector.extract_strided_slice %8 {offsets = [0, 0], sizes = [16, 256], strides = [1, 1]} : vector<16x512xf32> to vector<16x256xf32>
    %10 = vector.extract_strided_slice %8 {offsets = [0, 256], sizes = [16, 256], strides = [1, 1]} : vector<16x512xf32> to vector<16x256xf32>
    %cst_6 = arith.constant 0.000000e+00 : f32
    %11 = vector.broadcast %cst_6 : f32 to vector<16x256xf32>
    %12 = arith.maximumf %10, %11 : vector<16x256xf32>
    %13 = arith.mulf %9, %12 : vector<16x256xf32>
    %14 = arith.truncf %13 : vector<16x256xf32> to vector<16x256xbf16>
    %c0_7 = arith.constant 0 : index
    %c0_8 = arith.constant 0 : index
    %15 = vector.load %arg8[%c0_7, %c0_8] : memref<16x128xf32, #tpu.memory_space<vmem>>, vector<16x128xf32>
    %c0_9 = arith.constant 0 : index
    %c0_10 = arith.constant 0 : index
    %16 = vector.load %arg5[%c0_9, %c0_10] : memref<256x128xbf16, #tpu.memory_space<vmem>>, vector<256x128xbf16>
    %cst_11 = arith.constant dense<0.000000e+00> : vector<16x128xf32>
    %17 = tpu.matmul %14, %16, %cst_11 {dimension_numbers = #tpu.dot_dimension_numbers<[1], [0], [0], [1], [0, 0, 1, 1], [], []>} : vector<16x256xbf16>, vector<256x128xbf16>, vector<16x128xf32> -> vector<16x128xf32>
    %18 = arith.addf %15, %17 : vector<16x128xf32>
    %c0_12 = arith.constant 0 : index
    %c0_13 = arith.constant 0 : index
    %19 = vector.load %arg8[%c0_12, %c0_13] : memref<16x128xf32, #tpu.memory_space<vmem>>, vector<16x128xf32>
    tpu.vector_store %arg8[%c0_12, %c0_13], %18 {strides = array<i32>} : memref<16x128xf32, #tpu.memory_space<vmem>>, vector<16x128xf32>,
    %c0_i32_14 = arith.constant 0 : i32
    %20 = arith.cmpi eq, %arg1, %c0_i32_14 : i32
    %21 = arith.extui %20 : i1 to i32
    %c0_i32_15 = arith.constant 0 : i32
    %22 = arith.cmpi ne, %21, %c0_i32_15 : i32
    scf.if %22 {
      %c0_16 = arith.constant 0 : index
      %c0_17 = arith.constant 0 : index
      %23 = vector.load %arg8[%c0_16, %c0_17] : memref<16x128xf32, #tpu.memory_space<vmem>>, vector<16x128xf32>
      %c0_18 = arith.constant 0 : index
      %c0_19 = arith.constant 0 : index
      %24 = vector.load %arg6[%c0_18, %c0_19] : memref<1x128xf32, #tpu.memory_space<vmem>>, vector<1x128xf32>
      %25 = vector.broadcast %24 : vector<1x128xf32> to vector<16x128xf32>
      %26 = arith.addf %23, %25 : vector<16x128xf32>
      %c0_20 = arith.constant 0 : index
      %c0_21 = arith.constant 0 : index
      %27 = vector.load %arg7[%c0_20, %c0_21] : memref<16x128xf32, #tpu.memory_space<vmem>>, vector<16x128xf32>
      tpu.vector_store %arg7[%c0_20, %c0_21], %26 {strides = array<i32>} : memref<16x128xf32, #tpu.memory_space<vmem>>, vector<16x128xf32>,
    } else {
    }
    return
  }
  func.func @transform_0(%arg0: i32, %arg1: i32) -> (i32, i32) {
    %c0_i32 = arith.constant 0 : i32
    %c0_i32_0 = arith.constant 0 : i32
    return %arg0, %c0_i32 : i32, i32
  }
  func.func @transform_1(%arg0: i32, %arg1: i32) -> (i32, i32) {
    %c0_i32 = arith.constant 0 : i32
    %c0_i32_0 = arith.constant 0 : i32
    return %c0_i32, %arg1 : i32, i32
  }
  func.func @transform_2(%arg0: i32, %arg1: i32) -> (i32, i32) {
    %c0_i32 = arith.constant 0 : i32
    %c0_i32_0 = arith.constant 0 : i32
    return %c0_i32, %arg1 : i32, i32
  }
  func.func @transform_3(%arg0: i32, %arg1: i32) -> (i32, i32) {
    %c0_i32 = arith.constant 0 : i32
    %c0_i32_0 = arith.constant 0 : i32
    return %arg1, %c0_i32 : i32, i32
  }
  func.func @transform_4(%arg0: i32, %arg1: i32) -> (i32, i32) {
    %c0_i32 = arith.constant 0 : i32
    %c0_i32_0 = arith.constant 0 : i32
    %c0_i32_1 = arith.constant 0 : i32
    return %c0_i32, %c0_i32_0 : i32, i32
  }
  func.func @transform_5(%arg0: i32, %arg1: i32) -> (i32, i32) {
    %c0_i32 = arith.constant 0 : i32
    %c0_i32_0 = arith.constant 0 : i32
    return %arg0, %c0_i32 : i32, i32
  }
}

</mosaic_0001>

<bundles_post_ra>
// kernel: tpu_custom_call.1
= control target key start
LH: loop header
LB: loop body
LE: loop exit
PB: predicated region body
PF: predicated region fallthrough
CT: control target
= control target key end

     0   :  { %10 = vsyncpa [#allocation4], 0  ;;  %s933_s0 = inlined_call_operand.hbm [shape: bf16[16,128], index: 0, kind: input, shape index: {}]   ;;  %s934_s1 = inlined_call_operand.hbm [shape: bf16[128,512], index: 1, kind: input, shape index: {}]   ;;  %s935_s2 = inlined_call_operand.vmem [shape: f32[1,512], index: 2, kind: input, shape index: {}]   ;;  %s936_s3 = inlined_call_operand.hbm [shape: bf16[256,128], index: 3, kind: input, shape index: {}]   ;;  %s937_s4 = inlined_call_operand.vmem [shape: f32[1,128], index: 4, kind: input, shape index: {}]   ;;  %s938_s5 = inlined_call_operand.hbm [shape: f32[16,128], index: 5, kind: output, shape index: {}]  }
   0x1   :  { %11 = vsyncpa [#allocation7], 0 }
   0x2   :  { %12 = vsyncpa [#allocation5], 0  ;;  %s838_s18 = smov [#allocation6]   ;;  %s744_s22 = scalar_lea.hbm %s934_s1, 4096 }
   0x3   :  { %s30_s19 = sshll.u32 %s838_s18, 4  ;;  %p745_p0 = scmp.ne.s32.totalorder %s934_s1, %s744_s22  ;;  %s31_s19 = int_to_ptr.vmem [resolvable:$true] %s30_s19 }
   0x4   :  { %p748_p1 = scmp.lt.u32.totalorder %s744_s22, %s934_s1 }
   0x6   :  { %p750_p2 = pnand %p748_p1, %p745_p0 }
   0x8   :  { %753 = shalt.err (!%p750_p2)
}
   0x9   :  { %s754_s27 = scalar_lea.vmem %s31_s19, 4096  ;;  %p759_p4 = scmp.lt.s32.totalorder %s31_s19, %s31_s19 }
   0xa   :  { %p755_p3 = scmp.ne.s32.totalorder %s31_s19, %s754_s27  ;;  %p760_p5 = scmp.lt.s32.totalorder %s754_s27, %s754_s27 }
   0xc   :  { %p761_p6 = por %p760_p5, %p759_p4 }
   0xe   :  { %p762_p7 = pnand %p761_p6, %p755_p3 }
  0x10   :  { %765 = shalt.err (!%p762_p7)
}
  0x11   :  { %s839_s28 = smov 256   ;;  %s840_s29 = smov 16  }
  0x12   :  { %36 = dma.hbm_to_vmem [thread:$0]  %s934_s1, 4096, %s31_s19, [#allocation7], %s839_s28, %s839_s28, %s840_s29  }
  0x13   :  { %s841_s7 = smov [#allocation3]   ;;  %s766_s11 = scalar_lea.hbm %s933_s0, 128 }
  0x14   :  { %s18_s8 = sshll.u32 %s841_s7, 4  ;;  %p767_p8 = scmp.ne.s32.totalorder %s933_s0, %s766_s11  ;;  %s19_s8 = int_to_ptr.vmem [resolvable:$true] %s18_s8 }
  0x15   :  { %p770_p9 = scmp.lt.u32.totalorder %s766_s11, %s933_s0 }
  0x17   :  { %p772_p10 = pnand %p770_p9, %p767_p8 }
  0x19   :  { %775 = shalt.err (!%p772_p10)
}
  0x1a   :  { %s776_s16 = scalar_lea.vmem %s19_s8, 128  ;;  %p781_p12 = scmp.lt.s32.totalorder %s19_s8, %s19_s8 }
  0x1b   :  { %p777_p11 = scmp.ne.s32.totalorder %s19_s8, %s776_s16  ;;  %p782_p13 = scmp.lt.s32.totalorder %s776_s16, %s776_s16 }
  0x1d   :  { %p783_p0 = por %p782_p13, %p781_p12 }
  0x1f   :  { %p784_p1 = pnand %p783_p0, %p777_p11 }
  0x21   :  { %787 = shalt.err (!%p784_p1)
}
  0x22   :  { %s842_s1 = smov 64   ;;  %s843_s17 = smov 4  }
  0x23   :  { %24 = dma.hbm_to_vmem [thread:$0]  %s933_s0, 128, %s19_s8, [#allocation4], %s842_s1, %s842_s1, %s843_s17  }
  0x24   :  { %s844_s20 = smov [#allocation8]   ;;  %s788_s24 = scalar_lea.hbm %s936_s3, 2048 }
  0x25   :  { %s44_s21 = sshll.u32 %s844_s20, 4  ;;  %p789_p2 = scmp.ne.s32.totalorder %s936_s3, %s788_s24  ;;  %s45_s21 = int_to_ptr.vmem [resolvable:$true] %s44_s21 }
  0x26   :  { %p792_p3 = scmp.lt.u32.totalorder %s788_s24, %s936_s3 }
  0x28   :  { %p794_p4 = pnand %p792_p3, %p789_p2 }
  0x2a   :  { %797 = shalt.err (!%p794_p4)
}
  0x2b   :  { %s798_s29 = scalar_lea.vmem %s45_s21, 2048  ;;  %p803_p6 = scmp.lt.s32.totalorder %s45_s21, %s45_s21 }
  0x2c   :  { %p799_p5 = scmp.ne.s32.totalorder %s45_s21, %s798_s29  ;;  %p804_p7 = scmp.lt.s32.totalorder %s798_s29, %s798_s29 }
  0x2e   :  { %p805_p8 = por %p804_p7, %p803_p6 }
  0x30   :  { %p806_p9 = pnand %p805_p8, %p799_p5 }
  0x32   :  { %809 = shalt.err (!%p806_p9)
}
  0x33   :  { %50 = dma.hbm_to_vmem [thread:$0]  %s936_s3, 2048, %s45_s21, [#allocation7], %s842_s1, %s842_s1, %s843_s17  }
  0x34   :  { %832 = dma.done.wait [#allocation4], 128  }
  0x35   :  { %833 = vsyncadd [#allocation4], 4294967168 }
  0x36   :  { %834 = dma.done.wait [#allocation7], 6144  }
  0x37   :  { %835 = vsyncadd [#allocation7], 4294961152  ;;  %v845_v0 = vmov 0   ;;  %v679_v1 = vld [vmem:[#allocation6 + $0x4] ss:$16 sps:$4 sm:$0xff]   ;;  %v727_v34 = vld [vmem:[#allocation3] sm:$0xff]   ;;  %v105_v50 = vlaneseq }
  0x38   :  { %323 = vmatprep.mubr.bf16.mxu0 %v845_v0  ;;  %366 = vmatprep.mubr.bf16.mxu1 %v845_v0  ;;  %v681_v2 = vld [vmem:[#allocation6 + $0xc] ss:$16 sps:$4 sm:$0xff]   ;;  %v683_v3 = vld [vmem:[#allocation6] ss:$16 sps:$4 sm:$0xff]   ;;  %v684_v4 = vld [vmem:[#allocation6 + $0x8] ss:$16 sps:$4 sm:$0xff]  }
  0x39   :  { %291 = vmatprep.subr.bf16.mxu0 %v679_v1  ;;  %334 = vmatprep.subr.bf16.mxu1 %v681_v2  ;;  %v685_v5 = vld [vmem:[#allocation6 + $0x24] ss:$16 sps:$4 sm:$0xff]   ;;  %v687_v6 = vld [vmem:[#allocation6 + $0x2c] ss:$16 sps:$4 sm:$0xff]   ;;  %v689_v7 = vld [vmem:[#allocation6 + $0x20] ss:$16 sps:$4 sm:$0xff]  }
  0x3a   :  { %292 = vmatpush1.bf16.msra.mxu0 %v683_v3  ;;  %335 = vmatpush1.bf16.msra.mxu1 %v684_v4  ;;  %v690_v8 = vld [vmem:[#allocation6 + $0x28] ss:$16 sps:$4 sm:$0xff]   ;;  %v691_v9 = vld [vmem:[#allocation6 + $0x44] ss:$16 sps:$4 sm:$0xff]   ;;  %v693_v10 = vld [vmem:[#allocation6 + $0x4c] ss:$16 sps:$4 sm:$0xff]  }
  0x3b   :  { %293 = vmatprep.subr.bf16.mxu0 %v685_v5  ;;  %336 = vmatprep.subr.bf16.mxu1 %v687_v6  ;;  %v695_v11 = vld [vmem:[#allocation6 + $0x40] ss:$16 sps:$4 sm:$0xff]   ;;  %v696_v12 = vld [vmem:[#allocation6 + $0x48] ss:$16 sps:$4 sm:$0xff]   ;;  %v697_v13 = vld [vmem:[#allocation6 + $0x64] ss:$16 sps:$4 sm:$0xff]  }
  0x3c   :  { %v699_v14 = vld [vmem:[#allocation6 + $0x6c] ss:$16 sps:$4 sm:$0xff]   ;;  %v701_v15 = vld [vmem:[#allocation6 + $0x60] ss:$16 sps:$4 sm:$0xff]   ;;  %v702_v16 = vld [vmem:[#allocation6 + $0x68] ss:$16 sps:$4 sm:$0xff]  }
  0x3d   :  { %v703_v17 = vld [vmem:[#allocation6 + $0x84] ss:$16 sps:$4 sm:$0xff]   ;;  %v705_v18 = vld [vmem:[#allocation6 + $0x8c] ss:$16 sps:$4 sm:$0xff]   ;;  %v707_v19 = vld [vmem:[#allocation6 + $0x80] ss:$16 sps:$4 sm:$0xff]  }
  0x3e   :  { %294 = vmatpush1.bf16.msra.mxu0 %v689_v7  ;;  %337 = vmatpush1.bf16.msra.mxu1 %v690_v8  ;;  %v708_v20 = vld [vmem:[#allocation6 + $0x88] ss:$16 sps:$4 sm:$0xff]   ;;  %v709_v21 = vld [vmem:[#allocation6 + $0xa4] ss:$16 sps:$4 sm:$0xff]   ;;  %v711_v22 = vld [vmem:[#allocation6 + $0xac] ss:$16 sps:$4 sm:$0xff]  }
  0x3f   :  { %295 = vmatprep.subr.bf16.mxu0 %v691_v9  ;;  %338 = vmatprep.subr.bf16.mxu1 %v693_v10  ;;  %v713_v23 = vld [vmem:[#allocation6 + $0xa0] ss:$16 sps:$4 sm:$0xff]   ;;  %v714_v24 = vld [vmem:[#allocation6 + $0xa8] ss:$16 sps:$4 sm:$0xff]   ;;  %v715_v25 = vld [vmem:[#allocation6 + $0xc4] ss:$16 sps:$4 sm:$0xff]  }
  0x40   :  { %v717_v26 = vld [vmem:[#allocation6 + $0xcc] ss:$16 sps:$4 sm:$0xff]   ;;  %v719_v27 = vld [vmem:[#allocation6 + $0xc0] ss:$16 sps:$4 sm:$0xff]   ;;  %v720_v28 = vld [vmem:[#allocation6 + $0xc8] ss:$16 sps:$4 sm:$0xff]  }
  0x41   :  { %v721_v29 = vld [vmem:[#allocation6 + $0xe4] ss:$16 sps:$4 sm:$0xff]   ;;  %v723_v30 = vld [vmem:[#allocation6 + $0xec] ss:$16 sps:$4 sm:$0xff]   ;;  %v725_v31 = vld [vmem:[#allocation6 + $0xe0] ss:$16 sps:$4 sm:$0xff]  }
  0x42   :  { %296 = vmatpush1.bf16.msra.mxu0 %v695_v11  ;;  %339 = vmatpush1.bf16.msra.mxu1 %v696_v12  ;;  %v726_v32 = vld [vmem:[#allocation6 + $0xe8] ss:$16 sps:$4 sm:$0xff]   ;;  %v728_v33 = vld [vmem:[#allocation8 + $0x40] sm:$0xff]   ;;  %v732_v38 = vld [vmem:[#allocation8 + $0x50] sm:$0xff]   ;;  %v106_v51 = vshrl.u32 %v105_v50, 7  ;;  %s846_s8 = smov [#allocation9]  }
  0x43   :  { %297 = vmatprep.subr.bf16.mxu0 %v697_v13  ;;  %340 = vmatprep.subr.bf16.mxu1 %v699_v14  ;;  %v729_v35 = vld [vmem:[#allocation8] sm:$0xff]   ;;  %v730_v36 = vld [vmem:[#allocation8 + $0x48] sm:$0xff]   ;;  %v733_v39 = vld [vmem:[#allocation8 + $0x10] sm:$0xff]   ;;  %s583_s9 = sshll.u32 %s846_s8, 4  ;;  %s584_s9 = int_to_ptr.vmem [resolvable:$true] %s583_s9 }
  0x44   :  { %v731_v37 = vld [vmem:[#allocation8 + $0x8] sm:$0xff]   ;;  %v734_v40 = vld [vmem:[#allocation8 + $0x58] sm:$0xff]   ;;  %v736_v42 = vld [vmem:[#allocation8 + $0x60] sm:$0xff]   ;;  %v107_v52 = vsub.s32 0, %v106_v51  ;;  %v115_v53 = vsub.s32 2, %v106_v51  ;;  %v111_v55 = vsub.s32 1, %v106_v51  ;;  %p815_p11 = scmp.lt.s32.totalorder %s584_s9, %s584_s9 }
  0x45   :  { %v735_v41 = vld [vmem:[#allocation8 + $0x18] sm:$0xff]   ;;  %v737_v43 = vld [vmem:[#allocation8 + $0x20] sm:$0xff]   ;;  %v738_v44 = vld [vmem:[#allocation8 + $0x68] sm:$0xff]   ;;  %v119_v56 = vsub.s32 3, %v106_v51  ;;  %s810_s10 = scalar_lea.vmem %s584_s9, 256 }
  0x46   :  { %298 = vmatpush1.bf16.msra.mxu0 %v701_v15  ;;  %341 = vmatpush1.bf16.msra.mxu1 %v702_v16  ;;  %v739_v45 = vld [vmem:[#allocation8 + $0x28] sm:$0xff]   ;;  %v740_v46 = vld [vmem:[#allocation8 + $0x70] sm:$0xff]   ;;  %v742_v48 = vld [vmem:[#allocation8 + $0x78] sm:$0xff]   ;;  %p811_p10 = scmp.ne.s32.totalorder %s584_s9, %s810_s10  ;;  %p816_p12 = scmp.lt.s32.totalorder %s810_s10, %s810_s10 }
  0x47   :  { %299 = vmatprep.subr.bf16.mxu0 %v703_v17  ;;  %342 = vmatprep.subr.bf16.mxu1 %v705_v18  ;;  %v741_v47 = vld [vmem:[#allocation8 + $0x30] sm:$0xff]   ;;  %v743_v49 = vld [vmem:[#allocation8 + $0x38] sm:$0xff]  }
  0x48   :  { %v103_v54 = vld [vmem:[%s935_s2] sm:$0xf]  ;;  %p817_p13 = por %p816_p12, %p815_p11 }
  0x49   :  { %v108_v57 = vrot.slane %v103_v54, %v107_v52  ;;  %v116_v58 = vrot.slane %v103_v54, %v115_v53  ;;  %v112_v59 = vrot.slane %v103_v54, %v111_v55  ;;  %v120_v60 = vrot.slane %v103_v54, %v119_v56 }
  0x4a   :  { %300 = vmatpush1.bf16.msra.mxu0 %v707_v19  ;;  %343 = vmatpush1.bf16.msra.mxu1 %v708_v20  ;;  %p818_p0 = pnand %p817_p13, %p811_p10 }
  0x4b   :  { %301 = vmatprep.subr.bf16.mxu0 %v709_v21  ;;  %344 = vmatprep.subr.bf16.mxu1 %v711_v22 }
  0x4e   :  { %302 = vmatpush1.bf16.msra.mxu0 %v713_v23  ;;  %345 = vmatpush1.bf16.msra.mxu1 %v714_v24 }
  0x4f   :  { %303 = vmatprep.subr.bf16.mxu0 %v715_v25  ;;  %346 = vmatprep.subr.bf16.mxu1 %v717_v26  ;;  %v645_v25 = vld [vmem:[%s937_s4] ss:$0 sm:$0xff] }
  0x52   :  { %304 = vmatpush1.bf16.msra.mxu0 %v719_v27  ;;  %347 = vmatpush1.bf16.msra.mxu1 %v720_v28 }
  0x53   :  { %305 = vmatprep.subr.bf16.mxu0 %v721_v29  ;;  %348 = vmatprep.subr.bf16.mxu1 %v723_v30 }
  0x56   :  { %306 = vmatpush1.bf16.msra.mxu0 %v725_v31  ;;  %349 = vmatpush1.bf16.msra.mxu1 %v726_v32 }
  0x57   :  { %646 = vmatprep.subr.bf16.mxu0 %v728_v33 }
  0x59   :  { %324 = vmatmul.mubr.bf16.vlgmr.msra.gmra.mrb[0].mxu0 %v727_v34  ;;  %367 = vmatmul.mubr.bf16.vlgmr.msra.gmra.mrb[0].mxu1 %v727_v34 }
  0x5a   :  { %647 = vmatpush3.bf16.msra.mxu0 %v729_v35 }
  0x5b   :  { %648 = vmatprep.subr.bf16.mxu0 %v730_v36 }
  0x5e   :  { %649 = vmatpush3.bf16.msra.mxu0 %v731_v37 }
  0x5f   :  { %650 = vmatprep.subr.bf16.mxu0 %v732_v38 }
  0x62   :  { %651 = vmatpush3.bf16.msra.mxu0 %v733_v39 }
  0x63   :  { %652 = vmatprep.subr.bf16.mxu0 %v734_v40 }
  0x66   :  { %653 = vmatpush3.bf16.msra.mxu0 %v735_v41 }
  0x67   :  { %654 = vmatprep.subr.bf16.mxu0 %v736_v42 }
  0x6a   :  { %655 = vmatpush3.bf16.msra.mxu0 %v737_v43 }
  0x6b   :  { %656 = vmatprep.subr.bf16.mxu0 %v738_v44 }
  0x6e   :  { %657 = vmatpush3.bf16.msra.mxu0 %v739_v45 }
  0x6f   :  { %658 = vmatprep.subr.bf16.mxu0 %v740_v46 }
  0x72   :  { %659 = vmatpush3.bf16.msra.mxu0 %v741_v47 }
  0x73   :  { %660 = vmatprep.subr.bf16.mxu0 %v742_v48 }
  0x76   :  { %661 = vmatpush3.bf16.msra.mxu0 %v743_v49 }
 0x12c   :  { %v325_v61 = vpop.f32.mrb[0].mxu0  ;;  %v368_v62 = vpop.f32.mrb[0].mxu1 }
 0x12d   :  { %v326_v63 = vadd.f32 %v325_v61, %v108_v57  ;;  %v369_v0 = vadd.f32 %v368_v62, %v116_v58  ;;  %v327_v1 = vpop.f32.mrb[1].mxu0  ;;  %v370_v2 = vpop.f32.mrb[1].mxu1 }
 0x12e   :  { %v328_v3 = vadd.f32 %v327_v1, %v112_v59  ;;  %v371_v4 = vadd.f32 %v370_v2, %v120_v60  ;;  %v329_v5 = vpop.f32.mrb[2].mxu0  ;;  %v372_v6 = vpop.f32.mrb[2].mxu1 }
 0x12f   :  { %v377_v7 = vmax.f32 %v369_v0, 0.0  ;;  %v373_v8 = vadd.f32 %v372_v6, %v116_v58  ;;  %v331_v9 = vpop.f32.mrb[3].mxu0  ;;  %v374_v10 = vpop.f32.mrb[3].mxu1  ;;  %v330_v14 = vadd.f32 %v329_v5, %v108_v57 }
 0x130   :  { %v378_v11 = vmax.f32 %v371_v4, 0.0  ;;  %v375_v12 = vadd.f32 %v374_v10, %v120_v60  ;;  %v332_v17 = vadd.f32 %v331_v9, %v112_v59 }
 0x131   :  { %v381_v13 = vmul.f32 %v377_v7, %v326_v63  ;;  %v379_v15 = vmax.f32 %v373_v8, 0.0 }
 0x132   :  { %v382_v16 = vmul.f32 %v378_v11, %v328_v3  ;;  %v380_v18 = vmax.f32 %v375_v12, 0.0 }
 0x133   :  { %v383_v19 = vmul.f32 %v379_v15, %v330_v14 }
 0x134   :  { %v384_v20 = vmul.f32 %v380_v18, %v332_v17 }
 0x135   :  { %v385_v21 = vpack.c.bf16 %v383_v19, %v381_v13 }
 0x136   :  { %v386_v22 = vpack.c.bf16 %v384_v20, %v382_v16 }
 0x138   :  { %549 = vmatprep.mubr.bf16.mxu0 %v386_v22 }
 0x139   :  { %550 = vmatmul.mubr.bf16.vlgmr.msra.gmra.mrb[4].mxu0 %v385_v21 }
 0x20c   :  { %v662_v23 = vpop.f32.mrb[4].mxu0 }
 0x20d   :  { %v663_v24 = vpop.f32.mrb[5].mxu0 }
 0x20e   :  { %v664_v26 = vadd.f32 %v663_v24, %v662_v23  ;;  %v665_v27 = vpop.f32.mrb[6].mxu0 }
 0x20f   :  { %v666_v28 = vpop.f32.mrb[7].mxu0 }
 0x210   :  { %v574_v29 = vadd.f32 %v664_v26, %v645_v25  ;;  %v667_v30 = vadd.f32 %v666_v28, %v665_v27 }
 0x212   :  { %576 = vst [vmem:[#allocation9] sm:$0xff] %v574_v29  ;;  %v575_v31 = vadd.f32 %v667_v30, %v645_v25 }
 0x214   :  { %577 = vst [vmem:[#allocation9 + $0x8] sm:$0xff] %v575_v31 }
 0x215   :  { %821 = shalt.err (!%p818_p0)
}
 0x216   :  { %s822_s12 = scalar_lea.hbm %s938_s5, 256 }
 0x217   :  { %p823_p1 = scmp.ne.s32.totalorder %s938_s5, %s822_s12  ;;  %p826_p2 = scmp.lt.u32.totalorder %s822_s12, %s938_s5 }
 0x219   :  { %p828_p3 = pnand %p826_p2, %p823_p1 }
 0x21b   :  { %831 = shalt.err (!%p828_p3)
}
 0x21c   :  { %s847_s1 = smov 128   ;;  %s848_s17 = smov 8  }
 0x21d   :  { %589 = dma.vmem_to_hbm [thread:$0]  %s584_s9, 256, %s938_s5, [#allocation5], %s847_s1, %s847_s1, %s848_s17  }
 0x21e   :  { %836 = dma.done.wait [#allocation5], 256  }
 0x21f   :  { %837 = vsyncadd [#allocation5], 4294967040 }
 0x220   :  { %593 = vsyncpa [#allocation4], 1 }
 0x221   :  { %594 = vsyncpa [#allocation7], 1 }
 0x222   :  { %595 = vsyncpa [#allocation5], 1 }

</bundles_post_ra>
